<compile_context>
chip_gen: v6e
topology: v6e:2x2x1
jax: 0.10.0
libtpu: 0.0.40
codegen_flags: <defaults>
</compile_context>

<pallas_src>
import jax
import jax.numpy as jnp
from jax.experimental import pallas as pl
from jax.experimental.pallas import tpu as pltpu


def _round_up(x, m):
    return pl.cdiv(x, m) * m


def textcnn_kernel(win_ref, wconv_ref, bconv_ref, mask_ref, wfc_ref, bfc_ref, out_ref):
    # One MXU matmul for ALL conv branches and all time positions:
    # (L_pad, TB, kmax*D) x (kmax*D, N_pad) -> (L_pad, TB, N_pad), f32 accumulate.
    acc = jax.lax.dot_general(
        win_ref[...], wconv_ref[...],
        dimension_numbers=(((2,), (0,)), ((), ())),
        preferred_element_type=jnp.float32)

    acc = jnp.maximum(acc + bconv_ref[...], 0.0)   # fused conv bias + ReLU
    acc = acc * mask_ref[...]                      # zero invalid positions (ReLU >= 0 => safe)

    # Max-over-time: reduce the leading axis -> elementwise max across L_pad slabs.
    feat = jnp.max(acc, axis=0)                    # (TB, N_pad), lane-dense

    logits = jnp.dot(feat, wfc_ref[...],
                     preferred_element_type=jnp.float32) + bfc_ref[...]
    out_ref[...] = logits.astype(out_ref.dtype)    # (TB, C_pad) full-width store


def textcnn_forward(token_ids, emb_table, conv_ws, conv_bs, wfc, bfc,
                    kernel_sizes, class_num, *, tile_b=256):
    B, S = token_ids.shape
    Co = conv_ws[0].shape[0]
    D = emb_table.shape[1]
    nk = len(kernel_sizes)
    kmin, kmax = min(kernel_sizes), max(kernel_sizes)
    L_pad = S - kmin + 1                  # conv output positions computed per branch
    S_pad = L_pad + kmax - 1              # seq padded so every kmax-tap window stays in bounds
    N = nk * Co
    N_pad = _round_up(N, 128)             # lane-pad fused conv output width
    C_pad = _round_up(class_num, 128)     # lane-pad logits so the output store is unmasked

    # Batch tile: clamp the requested tile to the (8-rounded) batch so tiny batches are not
    # padded to a huge tile; for large batches the default 256 gives M = tile_b*L_pad in the
    # MXU-friendly range and B_pad // tile_b grid steps to pipeline / split across 2 TCs.
    tile_b = max(8, min(tile_b, _round_up(B, 8)))
    B_pad = _round_up(B, tile_b)
    grid = (B_pad // tile_b,)

    # ---- host-side weight packing (static, done once) ----
    w_slab = jnp.zeros((kmax * D, N_pad), jnp.float32)    # fused conv weight slab
    b_slab = jnp.zeros((1, 1, N_pad), jnp.float32)        # fused conv bias
    mask = jnp.zeros((L_pad, 1, N_pad), jnp.float32)      # 1 = valid time position for that column
    mask = mask.at[:, :, N:].set(1.0)                     # padding columns: all-zero output anyway
    for idx, (k, w, b) in enumerate(zip(kernel_sizes, conv_ws, conv_bs)):
        c0 = idx * Co
        for i in range(k):
            w_slab = w_slab.at[i * D:(i + 1) * D, c0:c0 + Co].set(w[:, i, :].T)
        b_slab = b_slab.at[0, 0, c0:c0 + Co].set(b.reshape(Co))
        mask = mask.at[:S - k + 1, :, c0:c0 + Co].set(1.0)
    w_slab = w_slab.astype(jnp.bfloat16)                  # bf16 MXU operand, f32 accumulate
    # FC: pre-transposed, rows padded to N_pad, columns padded to C_pad (zeros -> no contribution)
    wfc_p = jnp.zeros((N_pad, C_pad), jnp.float32).at[:N, :class_num].set(wfc.T)
    bfc_p = jnp.zeros((1, C_pad), jnp.float32).at[:, :class_num].set(bfc.reshape(1, class_num))

    # ---- embedding gather + host im2col (plain-JAX glue) ----
    emb = jnp.take(emb_table, token_ids, axis=0).astype(jnp.bfloat16)    # (B, S, D) bf16
    emb = jnp.pad(emb, ((0, B_pad - B), (0, S_pad - S), (0, 0)))         # pad batch + seq
    # im2col: kmax taps concatenated on the lane axis, then time-major for the kernel.
    win = jnp.concatenate([emb[:, t:t + L_pad, :] for t in range(kmax)], axis=-1)
    win = jnp.transpose(win, (1, 0, 2))                                  # (L_pad, B_pad, kmax*D)

    # VMEM working set (2x win block + residents + f32 acc) is << default scoped VMEM on all
    # of v5e/v6e/v7x at these sizes, so no vmem_limit_bytes override is requested.
    logits = pl.pallas_call(
        textcnn_kernel,
        out_shape=jax.ShapeDtypeStruct((B_pad, C_pad), jnp.float32),
        grid=grid,
        in_specs=[
            pl.BlockSpec((L_pad, tile_b, kmax * D), lambda i: (0, i, 0)),  # batch-tiled window slab
            pl.BlockSpec(w_slab.shape, lambda i: (0, 0)),                  # resident fused conv weights
            pl.BlockSpec(b_slab.shape, lambda i: (0, 0, 0)),               # resident fused conv bias
            pl.BlockSpec(mask.shape, lambda i: (0, 0, 0)),                 # resident validity mask
            pl.BlockSpec(wfc_p.shape, lambda i: (0, 0)),                   # resident FC weight
            pl.BlockSpec(bfc_p.shape, lambda i: (0, 0)),                   # resident FC bias
        ],
        out_specs=pl.BlockSpec((tile_b, C_pad), lambda i: (i, 0)),         # lane-dense output blocks
        compiler_params=pltpu.CompilerParams(
            dimension_semantics=("parallel",)),                            # shard batch tiles over TCs
    )(win, w_slab, b_slab, mask, wfc_p, bfc_p)

    return logits[:B, :class_num]


if __name__ == "__main__":
    # Small, deterministic configuration consistent with the module's __init__/forward.
    vocab_size = 20
    embd_dim = 32
    batch = 10                 # intentionally not a multiple of 8
    seq_len = 8
    kernel_num = 4             # Co
    kernel_sizes = (3, 4, 5)
    class_num = 3

    key = jax.random.PRNGKey(0)
    k_emb, k_ids, k_fc, k_fcb, *k_convs = jax.random.split(key, 4 + 2 * len(kernel_sizes))

    # Embedding table (weights_matrix). padding_idx only affects training, not the forward lookup.
    emb_table = jax.random.normal(k_emb, (vocab_size, embd_dim), jnp.float32) * 0.1

    # Conv weights: nn.Conv2d(1, Co, (k, embd_dim)) -> weight (Co, 1, k, D); stored here as (Co, k, D).
    conv_ws, conv_bs = [], []
    for i, k in enumerate(kernel_sizes):
        conv_ws.append(jax.random.normal(k_convs[2 * i], (kernel_num, k, embd_dim),
                                         jnp.float32) * 0.1)
        conv_bs.append(jax.random.normal(k_convs[2 * i + 1], (1, kernel_num),
                                         jnp.float32) * 0.1)

    # FC: nn.Linear(Co * len(kernel_sizes), class_num)
    wfc = jax.random.normal(k_fc, (class_num, kernel_num * len(kernel_sizes)),
                            jnp.float32) * 0.1
    bfc = jax.random.normal(k_fcb, (1, class_num), jnp.float32) * 0.1

    token_ids = jax.random.randint(k_ids, (batch, seq_len), 0, vocab_size, jnp.int32)

    logits = textcnn_forward(token_ids, emb_table, conv_ws, conv_bs, wfc, bfc,
                             kernel_sizes, class_num)
    jax.block_until_ready(logits)

    # Pure-JAX reference with the same bf16 rounding of the matmul operands (f32 math otherwise).
    emb_q = jnp.take(emb_table, token_ids, axis=0).astype(jnp.bfloat16).astype(jnp.float32)
    feats = []
    for w, b, k in zip(conv_ws, conv_bs, kernel_sizes):
        w_q = w.astype(jnp.bfloat16).astype(jnp.float32)
        L = seq_len - k + 1
        acc = jnp.zeros((batch, L, kernel_num), jnp.float32)
        for i in range(k):
            acc = acc + jnp.einsum("bld,cd->blc", emb_q[:, i:i + L, :], w_q[:, i, :])
        feats.append(jnp.max(jnp.maximum(acc + b[:, None, :], 0.0), axis=1))
    ref = jnp.concatenate(feats, axis=1) @ wfc.T + bfc

    assert logits.shape == (batch, class_num)
    assert jnp.allclose(logits, ref, atol=1e-4, rtol=1e-3), (logits, ref)

    print("KERNEL_OK")
</pallas_src>

<mosaic_0001>
module attributes {stable_mosaic.version = 11 : i64} {
  func.func @textcnn_kernel(%arg0: i32, %arg1: memref<6x16x160xbf16, #tpu.memory_space<vmem>>, %arg2: memref<160x128xbf16, #tpu.memory_space<vmem>>, %arg3: memref<1x1x128xf32, #tpu.memory_space<vmem>>, %arg4: memref<6x1x128xf32, #tpu.memory_space<vmem>>, %arg5: memref<128x128xf32, #tpu.memory_space<vmem>>, %arg6: memref<1x128xf32, #tpu.memory_space<vmem>>, %arg7: memref<16x128xf32, #tpu.memory_space<vmem>>) attributes {dimension_semantics = [#tpu.dimension_semantics<parallel>], iteration_bounds = array<i64: 1>, scalar_prefetch = 0 : i64, scratch_operands = 0 : i64, tpu.core_type = #tpu.core_type<tc>, window_params = [{transform_indices = @transform_0, window_bounds = array<i64: 6, 16, 160>}, {pipeline_mode = #tpu.pipeline_mode<synchronous>, transform_indices = @transform_1, window_bounds = array<i64: 160, 128>}, {pipeline_mode = #tpu.pipeline_mode<synchronous>, transform_indices = @transform_2, window_bounds = array<i64: 1, 1, 128>}, {pipeline_mode = #tpu.pipeline_mode<synchronous>, transform_indices = @transform_3, window_bounds = array<i64: 6, 1, 128>}, {pipeline_mode = #tpu.pipeline_mode<synchronous>, transform_indices = @transform_4, window_bounds = array<i64: 128, 128>}, {pipeline_mode = #tpu.pipeline_mode<synchronous>, transform_indices = @transform_5, window_bounds = array<i64: 1, 128>}, {transform_indices = @transform_6, window_bounds = array<i64: 16, 128>}]} {
    %c0 = arith.constant 0 : index
    %c0_0 = arith.constant 0 : index
    %c0_1 = arith.constant 0 : index
    %0 = vector.load %arg1[%c0, %c0_0, %c0_1] : memref<6x16x160xbf16, #tpu.memory_space<vmem>>, vector<6x16x160xbf16>
    %c0_2 = arith.constant 0 : index
    %c0_3 = arith.constant 0 : index
    %1 = vector.load %arg2[%c0_2, %c0_3] : memref<160x128xbf16, #tpu.memory_space<vmem>>, vector<160x128xbf16>
    %cst = arith.constant dense<0.000000e+00> : vector<6x16x128xf32>
    %2 = tpu.matmul %0, %1, %cst {dimension_numbers = #tpu.dot_dimension_numbers<[2], [0], [0, 1], [1], [0, 0, 0, 1, 1, 1], [], []>} : vector<6x16x160xbf16>, vector<160x128xbf16>, vector<6x16x128xf32> -> vector<6x16x128xf32>
    %c0_4 = arith.constant 0 : index
    %c0_5 = arith.constant 0 : index
    %c0_6 = arith.constant 0 : index
    %3 = vector.load %arg3[%c0_4, %c0_5, %c0_6] : memref<1x1x128xf32, #tpu.memory_space<vmem>>, vector<1x1x128xf32>
    %4 = vector.broadcast %3 : vector<1x1x128xf32> to vector<6x16x128xf32>
    %5 = arith.addf %2, %4 : vector<6x16x128xf32>
    %cst_7 = arith.constant 0.000000e+00 : f32
    %6 = vector.broadcast %cst_7 : f32 to vector<6x16x128xf32>
    %7 = arith.maximumf %5, %6 : vector<6x16x128xf32>
    %c0_8 = arith.constant 0 : index
    %c0_9 = arith.constant 0 : index
    %c0_10 = arith.constant 0 : index
    %8 = vector.load %arg4[%c0_8, %c0_9, %c0_10] : memref<6x1x128xf32, #tpu.memory_space<vmem>>, vector<6x1x128xf32>
    %9 = vector.broadcast %8 : vector<6x1x128xf32> to vector<6x16x128xf32>
    %10 = arith.mulf %7, %9 : vector<6x16x128xf32>
    %cst_11 = arith.constant dense<0xFF800000> : vector<16x128xf32>
    %11 = vector.multi_reduction <maximumf>, %10, %cst_11 [0] : vector<6x16x128xf32> to vector<16x128xf32>
    %c0_12 = arith.constant 0 : index
    %c0_13 = arith.constant 0 : index
    %12 = vector.load %arg5[%c0_12, %c0_13] : memref<128x128xf32, #tpu.memory_space<vmem>>, vector<128x128xf32>
    %cst_14 = arith.constant dense<0.000000e+00> : vector<16x128xf32>
    %13 = tpu.matmul %11, %12, %cst_14 {dimension_numbers = #tpu.dot_dimension_numbers<[1], [0], [0], [1], [0, 0, 1, 1], [], []>} : vector<16x128xf32>, vector<128x128xf32>, vector<16x128xf32> -> vector<16x128xf32>
    %c0_15 = arith.constant 0 : index
    %c0_16 = arith.constant 0 : index
    %14 = vector.load %arg6[%c0_15, %c0_16] : memref<1x128xf32, #tpu.memory_space<vmem>>, vector<1x128xf32>
    %15 = vector.broadcast %14 : vector<1x128xf32> to vector<16x128xf32>
    %16 = arith.addf %13, %15 : vector<16x128xf32>
    %c0_17 = arith.constant 0 : index
    %c0_18 = arith.constant 0 : index
    %17 = vector.load %arg7[%c0_17, %c0_18] : memref<16x128xf32, #tpu.memory_space<vmem>>, vector<16x128xf32>
    tpu.vector_store %arg7[%c0_17, %c0_18], %16 {strides = array<i32>} : memref<16x128xf32, #tpu.memory_space<vmem>>, vector<16x128xf32>,
    return
  }
  func.func @transform_0(%arg0: i32) -> (i32, i32, i32) {
    %c0_i32 = arith.constant 0 : i32
    %c0_i32_0 = arith.constant 0 : i32
    %c0_i32_1 = arith.constant 0 : i32
    return %c0_i32, %arg0, %c0_i32_0 : i32, i32, i32
  }
  func.func @transform_1(%arg0: i32) -> (i32, i32) {
    %c0_i32 = arith.constant 0 : i32
    %c0_i32_0 = arith.constant 0 : i32
    %c0_i32_1 = arith.constant 0 : i32
    return %c0_i32, %c0_i32_0 : i32, i32
  }
  func.func @transform_2(%arg0: i32) -> (i32, i32, i32) {
    %c0_i32 = arith.constant 0 : i32
    %c0_i32_0 = arith.constant 0 : i32
    %c0_i32_1 = arith.constant 0 : i32
    %c0_i32_2 = arith.constant 0 : i32
    return %c0_i32, %c0_i32_0, %c0_i32_1 : i32, i32, i32
  }
  func.func @transform_3(%arg0: i32) -> (i32, i32, i32) {
    %c0_i32 = arith.constant 0 : i32
    %c0_i32_0 = arith.constant 0 : i32
    %c0_i32_1 = arith.constant 0 : i32
    %c0_i32_2 = arith.constant 0 : i32
    return %c0_i32, %c0_i32_0, %c0_i32_1 : i32, i32, i32
  }
  func.func @transform_4(%arg0: i32) -> (i32, i32) {
    %c0_i32 = arith.constant 0 : i32
    %c0_i32_0 = arith.constant 0 : i32
    %c0_i32_1 = arith.constant 0 : i32
    return %c0_i32, %c0_i32_0 : i32, i32
  }
  func.func @transform_5(%arg0: i32) -> (i32, i32) {
    %c0_i32 = arith.constant 0 : i32
    %c0_i32_0 = arith.constant 0 : i32
    %c0_i32_1 = arith.constant 0 : i32
    return %c0_i32, %c0_i32_0 : i32, i32
  }
  func.func @transform_6(%arg0: i32) -> (i32, i32) {
    %c0_i32 = arith.constant 0 : i32
    %c0_i32_0 = arith.constant 0 : i32
    return %arg0, %c0_i32 : i32, i32
  }
}

</mosaic_0001>

<bundles_post_ra>
// kernel: tpu_custom_call.1
= control target key start
LH: loop header
LB: loop body
LE: loop exit
PB: predicated region body
PF: predicated region fallthrough
CT: control target
= control target key end

     0   :  { %11 = vsyncpa [#allocation3], 0  ;;  %s868_s0 = inlined_call_operand.hbm [shape: bf16[6,16,160], index: 0, kind: input, shape index: {}]   ;;  %s869_s1 = inlined_call_operand.hbm [shape: bf16[160,128], index: 1, kind: input, shape index: {}]   ;;  %s870_s2 = inlined_call_operand.vmem [shape: f32[1,1,128], index: 2, kind: input, shape index: {}]   ;;  %s871_s3 = inlined_call_operand.hbm [shape: f32[6,1,128], index: 3, kind: input, shape index: {}]   ;;  %s872_s4 = inlined_call_operand.hbm [shape: f32[128,128], index: 4, kind: input, shape index: {}]   ;;  %s873_s5 = inlined_call_operand.vmem [shape: f32[1,128], index: 5, kind: input, shape index: {}]   ;;  %s874_s6 = inlined_call_operand.hbm [shape: f32[16,128], index: 6, kind: output, shape index: {}]  }
   0x1   :  { %12 = vsyncpa [#allocation6], 0 }
   0x2   :  { %13 = vsyncpa [#allocation9], 0 }
   0x3   :  { %14 = vsyncpa [#allocation4], 0  ;;  %s785_s21 = smov [#allocation5]  }
   0x4   :  { %s32_s22 = sshll.u32 %s785_s21, 4  ;;  %s33_s22 = int_to_ptr.vmem [resolvable:$true] %s32_s22 }
   0x5   :  { %s685_s23 = scalar_lea.vmem %s33_s22, 1280  ;;  %p690_p1 = scmp.lt.s32.totalorder %s33_s22, %s33_s22 }
   0x6   :  { %p686_p0 = scmp.ne.s32.totalorder %s33_s22, %s685_s23  ;;  %p691_p2 = scmp.lt.s32.totalorder %s685_s23, %s685_s23 }
   0x8   :  { %p692_p3 = por %p691_p2, %p690_p1 }
   0xa   :  { %p693_p4 = pnand %p692_p3, %p686_p0 }
   0xc   :  { %696 = shalt.err (!%p693_p4)
}
   0xd   :  { %s786_s24 = smov 64   ;;  %s787_s25 = smov 4  }
   0xe   :  { %38 = dma.hbm_to_vmem [thread:$0]  %s869_s1, 1280, %s33_s22, [#allocation6], %s786_s24, %s786_s24, %s787_s25  }
   0xf   :  { %s788_s28 = smov [#allocation2]  }
  0x10   :  { %s20_s29 = sshll.u32 %s788_s28, 4  ;;  %s21_s29 = int_to_ptr.vmem [resolvable:$true] %s20_s29 }
  0x11   :  { %s705_s30 = scalar_lea.vmem %s21_s29, 1536  ;;  %p710_p6 = scmp.lt.s32.totalorder %s21_s29, %s21_s29 }
  0x12   :  { %p706_p5 = scmp.ne.s32.totalorder %s21_s29, %s705_s30  ;;  %p711_p7 = scmp.lt.s32.totalorder %s705_s30, %s705_s30 }
  0x14   :  { %p712_p8 = por %p711_p7, %p710_p6 }
  0x16   :  { %p713_p9 = pnand %p712_p8, %p706_p5 }
  0x18   :  { %716 = shalt.err (!%p713_p9)
}
  0x19   :  { %s789_s7 = smov 128   ;;  %s790_s8 = smov 8  }
  0x1a   :  { %26 = dma.hbm_to_vmem [thread:$0]  %s868_s0, 1536, %s21_s29, [#allocation3], %s789_s7, %s789_s7, %s790_s8  }
  0x1b   :  { %s791_s1 = smov [#allocation7]  }
  0x1c   :  { %s46_s11 = sshll.u32 %s791_s1, 4  ;;  %s47_s11 = int_to_ptr.vmem [resolvable:$true] %s46_s11 }
  0x1d   :  { %s725_s12 = scalar_lea.vmem %s47_s11, 96  ;;  %p730_p11 = scmp.lt.s32.totalorder %s47_s11, %s47_s11 }
  0x1e   :  { %p726_p10 = scmp.ne.s32.totalorder %s47_s11, %s725_s12  ;;  %p731_p12 = scmp.lt.s32.totalorder %s725_s12, %s725_s12 }
  0x20   :  { %p732_p13 = por %p731_p12, %p730_p11 }
  0x22   :  { %p733_p0 = pnand %p732_p13, %p726_p10 }
  0x24   :  { %736 = shalt.err (!%p733_p0)
}
  0x25   :  { %s792_s13 = smov 16   ;;  %s793_s14 = smov 1  }
  0x26   :  { %52 = dma.hbm_to_vmem [thread:$0]  %s871_s3, 96, %s47_s11, [#allocation6], %s792_s13, %s792_s13, %s793_s14  }
  0x27   :  { %s794_s17 = smov [#allocation8]  }
  0x28   :  { %s58_s18 = sshll.u32 %s794_s17, 4  ;;  %s59_s18 = int_to_ptr.vmem [resolvable:$true] %s58_s18 }
  0x29   :  { %s745_s0 = scalar_lea.vmem %s59_s18, 2048  ;;  %p750_p2 = scmp.lt.s32.totalorder %s59_s18, %s59_s18 }
  0x2a   :  { %p746_p1 = scmp.ne.s32.totalorder %s59_s18, %s745_s0  ;;  %p751_p3 = scmp.lt.s32.totalorder %s745_s0, %s745_s0 }
  0x2c   :  { %p752_p4 = por %p751_p3, %p750_p2 }
  0x2e   :  { %p753_p5 = pnand %p752_p4, %p746_p1 }
  0x30   :  { %756 = shalt.err (!%p753_p5)
}
  0x31   :  { %64 = dma.hbm_to_vmem [thread:$0]  %s872_s4, 2048, %s59_s18, [#allocation9], %s789_s7, %s789_s7, %s790_s8  }
  0x32   :  { %777 = dma.done.wait [#allocation3], 1536  }
  0x33   :  { %778 = vsyncadd [#allocation3], 4294965760 }
  0x34   :  { %779 = dma.done.wait [#allocation6], 1376  }
  0x35   :  { %780 = vsyncadd [#allocation6], 4294965920 }
  0x36   :  { %781 = dma.done.wait [#allocation9], 2048  }
  0x37   :  { %782 = vsyncadd [#allocation9], 4294965248  ;;  %v795_v0 = vmov 0   ;;  %v649_v1 = vld [vmem:[#allocation5 + $0x38] sm:$0xff]   ;;  %v650_v2 = vld [vmem:[#allocation5 + $0x30] sm:$0xff]   ;;  %vm233_vm0 = vcmask 261120  }
  0x38   :  { %252 = vmatprep.subr.bf16.mxu0 %v795_v0  ;;  %617 = vmatprep.subr.bf16.mxu1 %v795_v0  ;;  %v651_v3 = vld [vmem:[#allocation5 + $0x28] sm:$0xff]   ;;  %v652_v4 = vld [vmem:[#allocation5 + $0x20] sm:$0xff]   ;;  %v653_v7 = vld [vmem:[#allocation5 + $0x18] sm:$0xff]   ;;  %s796_s22 = smov [#allocation10]  }
  0x39   :  { %253 = vmatpush1.bf16.msra.mxu0 %v649_v1  ;;  %627 = vmatpush1.bf16.msra.mxu1 %v649_v1  ;;  %v661_v5 = vld [vmem:[#allocation2 + $0x4] ss:$8 sps:$4 sm:$0xff]   ;;  %v654_v8 = vld [vmem:[#allocation5 + $0x10] sm:$0xff]   ;;  %v659_v13 = vld [vmem:[#allocation2] ss:$8 sps:$4 sm:$0xff]   ;;  %s514_s23 = sshll.u32 %s796_s22, 4  ;;  %s515_s23 = int_to_ptr.vmem [resolvable:$true] %s514_s23 }
  0x3a   :  { %254 = vmatprep.subr.bf16.mxu0 %v795_v0  ;;  %618 = vmatprep.subr.bf16.mxu1 %v795_v0  ;;  %v664_v6 = vld [vmem:[#allocation2 + $0x24] ss:$8 sps:$4 sm:$0xff]   ;;  %v662_v14 = vld [vmem:[#allocation2 + $0x20] ss:$8 sps:$4 sm:$0xff]   ;;  %v665_v15 = vld [vmem:[#allocation2 + $0x14] ss:$8 sps:$4 sm:$0xff]   ;;  %p762_p7 = scmp.lt.s32.totalorder %s515_s23, %s515_s23 }
  0x3b   :  { %551 = vmatprep.mubr.msk.bf16.mxu0 %vm233_vm0, %v661_v5  ;;  %553 = vmatprep.mubr.msk.bf16.mxu1 %vm233_vm0, %v664_v6  ;;  %v655_v9 = vld [vmem:[#allocation5 + $0x8] sm:$0xff]   ;;  %v656_v10 = vld [vmem:[#allocation5] sm:$0xff]   ;;  %v667_v16 = vld [vmem:[#allocation2 + $0x34] ss:$8 sps:$4 sm:$0xff]   ;;  %s757_s24 = scalar_lea.vmem %s515_s23, 256 }
  0x3c   :  { %v657_v11 = vld [vmem:[#allocation5 + $0x48] sm:$0xff]   ;;  %v658_v12 = vld [vmem:[#allocation5 + $0x40] sm:$0xff]   ;;  %v669_v17 = vld [vmem:[#allocation2 + $0x10] ss:$8 sps:$4 sm:$0xff]   ;;  %p758_p6 = scmp.ne.s32.totalorder %s515_s23, %s757_s24  ;;  %p763_p8 = scmp.lt.s32.totalorder %s757_s24, %s757_s24 }
  0x3d   :  { %255 = vmatpush1.bf16.msra.mxu0 %v650_v2  ;;  %628 = vmatpush1.bf16.msra.mxu1 %v650_v2  ;;  %v670_v18 = vld [vmem:[#allocation2 + $0x30] ss:$8 sps:$4 sm:$0xff]   ;;  %v671_v19 = vld [vmem:[#allocation2 + $0x44] ss:$8 sps:$4 sm:$0xff]   ;;  %v673_v20 = vld [vmem:[#allocation2 + $0x40] ss:$8 sps:$4 sm:$0xff]  }
  0x3e   :  { %256 = vmatprep.subr.bf16.mxu0 %v795_v0  ;;  %619 = vmatprep.subr.bf16.mxu1 %v795_v0  ;;  %v674_v21 = vld [vmem:[#allocation2 + $0x54] ss:$8 sps:$4 sm:$0xff]   ;;  %v676_v22 = vld [vmem:[#allocation2 + $0x50] ss:$8 sps:$4 sm:$0xff]   ;;  %v423_v24 = vld [vmem:[#allocation8 + $0x70] sm:$0xff]  ;;  %p764_p9 = por %p763_p8, %p762_p7 }
  0x3f   :  { %v424_v23 = vld [vmem:[#allocation8 + $0x78] sm:$0xff]  ;;  %v422_v25 = vld [vmem:[#allocation8 + $0x68] sm:$0xff]  ;;  %v421_v26 = vld [vmem:[#allocation8 + $0x60] sm:$0xff] }
  0x40   :  { %v420_v27 = vld [vmem:[#allocation8 + $0x58] sm:$0xff]  ;;  %v419_v28 = vld [vmem:[#allocation8 + $0x50] sm:$0xff]  ;;  %v418_v29 = vld [vmem:[#allocation8 + $0x48] sm:$0xff]  ;;  %p765_p10 = pnand %p764_p9, %p758_p6 }
  0x41   :  { %257 = vmatpush1.bf16.msra.mxu0 %v651_v3  ;;  %629 = vmatpush1.bf16.msra.mxu1 %v651_v3  ;;  %v417_v30 = vld [vmem:[#allocation8 + $0x40] sm:$0xff]  ;;  %v416_v31 = vld [vmem:[#allocation8 + $0x38] sm:$0xff]  ;;  %v415_v32 = vld [vmem:[#allocation8 + $0x30] sm:$0xff] }
  0x42   :  { %258 = vmatprep.subr.bf16.mxu0 %v795_v0  ;;  %620 = vmatprep.subr.bf16.mxu1 %v795_v0  ;;  %v414_v33 = vld [vmem:[#allocation8 + $0x28] sm:$0xff]  ;;  %v413_v34 = vld [vmem:[#allocation8 + $0x20] sm:$0xff]  ;;  %v412_v35 = vld [vmem:[#allocation8 + $0x18] sm:$0xff] }
  0x43   :  { %v411_v36 = vld [vmem:[#allocation8 + $0x10] sm:$0xff]  ;;  %v410_v37 = vld [vmem:[#allocation8 + $0x8] sm:$0xff]  ;;  %v409_v38 = vld [vmem:[#allocation8] sm:$0xff] }
  0x44   :  { %v528_v51 = vld [vmem:[%s870_s2] ss:$0 sm:$0xff]  ;;  %v557_v1 = vld [vmem:[#allocation7] ss:$0 sm:$0xff]  ;;  %v559_v2 = vld [vmem:[#allocation7 + $0x2] ss:$0 sm:$0xff] }
  0x45   :  { %259 = vmatpush1.bf16.msra.mxu0 %v652_v4  ;;  %630 = vmatpush1.bf16.msra.mxu1 %v652_v4 }
  0x46   :  { %260 = vmatprep.subr.bf16.mxu0 %v795_v0  ;;  %621 = vmatprep.subr.bf16.mxu1 %v795_v0 }
  0x49   :  { %261 = vmatpush1.bf16.msra.mxu0 %v653_v7  ;;  %631 = vmatpush1.bf16.msra.mxu1 %v653_v7 }
  0x4a   :  { %262 = vmatprep.subr.bf16.mxu0 %v795_v0  ;;  %622 = vmatprep.subr.bf16.mxu1 %v795_v0 }
  0x4d   :  { %263 = vmatpush1.bf16.msra.mxu0 %v654_v8  ;;  %632 = vmatpush1.bf16.msra.mxu1 %v654_v8  ;;  %v558_v8 = vld [vmem:[#allocation7 + $0x1] ss:$0 sm:$0xff] }
  0x4e   :  { %264 = vmatprep.subr.bf16.mxu0 %v795_v0  ;;  %623 = vmatprep.subr.bf16.mxu1 %v795_v0 }
  0x51   :  { %265 = vmatpush1.bf16.msra.mxu0 %v655_v9  ;;  %633 = vmatpush1.bf16.msra.mxu1 %v655_v9  ;;  %v560_v9 = vld [vmem:[#allocation7 + $0x3] ss:$0 sm:$0xff] }
  0x52   :  { %266 = vmatprep.subr.bf16.mxu0 %v795_v0  ;;  %624 = vmatprep.subr.bf16.mxu1 %v795_v0 }
  0x55   :  { %267 = vmatpush1.bf16.msra.mxu0 %v656_v10  ;;  %634 = vmatpush1.bf16.msra.mxu1 %v656_v10 }
  0x56   :  { %280 = vmatprep.subr.bf16.mxu0 %v795_v0  ;;  %625 = vmatprep.subr.bf16.mxu1 %v795_v0 }
  0x59   :  { %281 = vmatpush2.bf16.msra.mxu0 %v657_v11  ;;  %635 = vmatpush2.bf16.msra.mxu1 %v657_v11 }
  0x5a   :  { %282 = vmatprep.subr.bf16.mxu0 %v795_v0  ;;  %626 = vmatprep.subr.bf16.mxu1 %v795_v0 }
  0x5d   :  { %283 = vmatpush2.bf16.msra.mxu0 %v658_v12  ;;  %636 = vmatpush2.bf16.msra.mxu1 %v658_v12 }
  0x5e   :  { %582 = vmatprep.subr.mxu1 %v424_v23 }
  0x60   :  { %285 = vmatmul.mubr.bf16.vlgmr.msra.gmra.mxu0 %v659_v13  ;;  %301 = vmatmul.mubr.bf16.vlgmr.msra.gmra.mxu1 %v662_v14 }
  0x61   :  { %552 = vmatprep.mubr.msk.bf16.mxu0 %vm233_vm0, %v665_v15  ;;  %554 = vmatprep.mubr.msk.bf16.mxu1 %vm233_vm0, %v667_v16 }
  0x62   :  { %583 = vmatpush3.msra.mxu1 %v424_v23 }
  0x63   :  { %584 = vmatprep.subr.mxu1 %v423_v24 }
  0x64   :  { %585 = vmatpush3.msra.mxu1 %v423_v24 }
  0x65   :  { %586 = vmatprep.subr.mxu1 %v422_v25 }
  0x66   :  { %587 = vmatpush3.msra.mxu1 %v422_v25 }
  0x67   :  { %588 = vmatprep.subr.mxu1 %v421_v26 }
  0x68   :  { %293 = vmatmul.mubr.bf16.gmra.mxu0 %v669_v17  ;;  %309 = vmatmul.mubr.bf16.gmra.mxu1 %v670_v18 }
  0x69   :  { %555 = vmatprep.mubr.msk.bf16.mxu1 %vm233_vm0, %v671_v19  ;;  %589 = vmatpush3.msra.mxu1 %v421_v26  ;;  %v562_v26 = vld [vmem:[#allocation7 + $0x5] ss:$0 sm:$0xff] }
  0x6a   :  { %590 = vmatprep.subr.mxu1 %v420_v27 }
  0x6b   :  { %591 = vmatpush3.msra.mxu1 %v420_v27 }
  0x6c   :  { %592 = vmatprep.subr.mxu1 %v419_v28 }
  0x6d   :  { %593 = vmatpush3.msra.mxu1 %v419_v28 }
  0x6e   :  { %594 = vmatprep.subr.mxu1 %v418_v29 }
  0x6f   :  { %595 = vmatpush3.msra.mxu1 %v418_v29 }
  0x70   :  { %317 = vmatmul.mubr.bf16.gmra.mxu1 %v673_v20  ;;  %596 = vmatprep.subr.mxu1 %v417_v30 }
  0x71   :  { %556 = vmatprep.mubr.msk.bf16.mxu1 %vm233_vm0, %v674_v21  ;;  %597 = vmatpush3.msra.mxu1 %v417_v30  ;;  %v561_v21 = vld [vmem:[#allocation7 + $0x4] ss:$0 sm:$0xff] }
  0x72   :  { %598 = vmatprep.subr.mxu1 %v416_v31 }
  0x73   :  { %599 = vmatpush3.msra.mxu1 %v416_v31 }
  0x74   :  { %600 = vmatprep.subr.mxu1 %v415_v32 }
  0x75   :  { %601 = vmatpush3.msra.mxu1 %v415_v32 }
  0x76   :  { %602 = vmatprep.subr.mxu1 %v414_v33 }
  0x77   :  { %603 = vmatpush3.msra.mxu1 %v414_v33 }
  0x78   :  { %325 = vmatmul.mubr.bf16.gmra.mxu1 %v676_v22  ;;  %604 = vmatprep.subr.mxu1 %v413_v34 }
  0x79   :  { %605 = vmatpush3.msra.mxu1 %v413_v34 }
  0x7a   :  { %606 = vmatprep.subr.mxu1 %v412_v35 }
  0x7b   :  { %607 = vmatpush3.msra.mxu1 %v412_v35 }
  0x7c   :  { %608 = vmatprep.subr.mxu1 %v411_v36 }
  0x7d   :  { %609 = vmatpush3.msra.mxu1 %v411_v36 }
  0x7e   :  { %610 = vmatprep.subr.mxu1 %v410_v37 }
  0x7f   :  { %611 = vmatpush3.msra.mxu1 %v410_v37 }
  0x80   :  { %612 = vmatprep.subr.mxu1 %v409_v38 }
  0x81   :  { %613 = vmatpush3.msra.mxu1 %v409_v38 }
 0x120   :  { %v286_v39 = vpop.f32.mrf.mxu0  ;;  %v302_v40 = vpop.f32.mrf.mxu1 }
 0x121   :  { %v287_v56 = vadd.f32 %v528_v51, %v286_v39  ;;  %v303_v57 = vadd.f32 %v528_v51, %v302_v40 }
 0x122   :  { %v288_v41 = vpop.f32.mrf.mxu0  ;;  %v304_v42 = vpop.f32.mrf.mxu1 }
 0x123   :  { %v333_v62 = vmax.f32 %v287_v56, 0.0  ;;  %v337_v63 = vmax.f32 %v303_v57, 0.0 }
 0x124   :  { %v289_v43 = vpop.f32.mrf.mxu0  ;;  %v305_v44 = vpop.f32.mrf.mxu1 }
 0x125   :  { %v290_v3 = vadd.f32 %v528_v51, %v289_v43  ;;  %v306_v4 = vadd.f32 %v528_v51, %v305_v44  ;;  %v387_v13 = vmul.f32 %v557_v1, %v333_v62  ;;  %v391_v14 = vmul.f32 %v559_v2, %v337_v63 }
 0x126   :  { %v291_v45 = vpop.f32.mrf.mxu0  ;;  %v307_v46 = vpop.f32.mrf.mxu1 }
 0x127   :  { %v334_v17 = vmax.f32 %v290_v3, 0.0  ;;  %v338_v18 = vmax.f32 %v306_v4, 0.0  ;;  %v399_v31 = vmax.f32 %v387_v13, %v391_v14 }
 0x128   :  { %v294_v47 = vpop.f32.mrf.mxu0  ;;  %v310_v48 = vpop.f32.mrf.mxu1 }
 0x129   :  { %v295_v58 = vadd.f32 %v528_v51, %v294_v47  ;;  %v311_v59 = vadd.f32 %v528_v51, %v310_v48  ;;  %v388_v32 = vmul.f32 %v557_v1, %v334_v17  ;;  %v392_v33 = vmul.f32 %v559_v2, %v338_v18 }
 0x12a   :  { %v296_v49 = vpop.f32.mrf.mxu0  ;;  %v312_v50 = vpop.f32.mrf.mxu1 }
 0x12b   :  { %v335_v5 = vmax.f32 %v295_v58, 0.0  ;;  %v339_v6 = vmax.f32 %v311_v59, 0.0  ;;  %v404_v45 = vmax.f32 %v388_v32, %v392_v33 }
 0x12c   :  { %v297_v52 = vpop.f32.mrf.mxu0  ;;  %v313_v53 = vpop.f32.mrf.mxu1 }
 0x12d   :  { %v298_v10 = vadd.f32 %v528_v51, %v297_v52  ;;  %v314_v11 = vadd.f32 %v528_v51, %v313_v53  ;;  %v389_v19 = vmul.f32 %v558_v8, %v335_v5  ;;  %v393_v20 = vmul.f32 %v560_v9, %v339_v6  ;;  %v563_v53 = vld [vmem:[%s873_s5] ss:$0 sm:$0xff] }
 0x12e   :  { %v315_v54 = vpop.f32.mrf.mxu1  ;;  %v299_v55 = vpop.f32.mrf.mxu0 }
 0x12f   :  { %v336_v23 = vmax.f32 %v298_v10, 0.0  ;;  %v340_v24 = vmax.f32 %v314_v11, 0.0  ;;  %v400_v34 = vmax.f32 %v389_v19, %v393_v20 }
 0x130   :  { %v318_v60 = vpop.f32.mrf.mxu1 }
 0x131   :  { %v319_v0 = vadd.f32 %v528_v51, %v318_v60  ;;  %v390_v36 = vmul.f32 %v558_v8, %v336_v23  ;;  %v394_v37 = vmul.f32 %v560_v9, %v340_v24 }
 0x132   :  { %v320_v61 = vpop.f32.mrf.mxu1 }
 0x133   :  { %v341_v15 = vmax.f32 %v319_v0, 0.0  ;;  %v405_v46 = vmax.f32 %v390_v36, %v394_v37 }
 0x134   :  { %v321_v7 = vpop.f32.mrf.mxu1 }
 0x135   :  { %v322_v16 = vadd.f32 %v528_v51, %v321_v7  ;;  %v395_v28 = vmul.f32 %v561_v21, %v341_v15 }
 0x136   :  { %v323_v12 = vpop.f32.mrf.mxu1 }
 0x137   :  { %v342_v29 = vmax.f32 %v322_v16, 0.0  ;;  %v401_v41 = vmax.f32 %v399_v31, %v395_v28 }
 0x138   :  { %v326_v22 = vpop.f32.mrf.mxu1 }
 0x139   :  { %v327_v25 = vadd.f32 %v528_v51, %v326_v22  ;;  %v396_v42 = vmul.f32 %v561_v21, %v342_v29 }
 0x13a   :  { %v328_v27 = vpop.f32.mrf.mxu1 }
 0x13b   :  { %v343_v30 = vmax.f32 %v327_v25, 0.0  ;;  %v406_v49 = vmax.f32 %v404_v45, %v396_v42 }
 0x13c   :  { %v329_v35 = vpop.f32.mrf.mxu1 }
 0x13d   :  { %v397_v38 = vmul.f32 %v562_v26, %v343_v30  ;;  %v330_v39 = vadd.f32 %v528_v51, %v329_v35 }
 0x13e   :  { %v331_v40 = vpop.f32.mrf.mxu1 }
 0x13f   :  { %v402_v43 = vmax.f32 %v400_v34, %v397_v38  ;;  %v344_v44 = vmax.f32 %v330_v39, 0.0 }
 0x141   :  { %v398_v47 = vmul.f32 %v562_v26, %v344_v44  ;;  %v403_v48 = vmax.f32 %v401_v41, %v402_v43 }
 0x143   :  { %v407_v50 = vmax.f32 %v405_v46, %v398_v47  ;;  %614 = vmatprep.mubr.f32.mxu1 %v403_v48 }
 0x145   :  { %v408_v52 = vmax.f32 %v406_v49, %v407_v50 }
 0x147   :  { %615 = vmatmul.mubr.f32.vlgmr.msra.gmra.mxu1 %v408_v52 }
 0x207   :  { %v616_v54 = vpop.f32.mrf.mxu1 }
 0x208   :  { %v504_v51 = vadd.f32 %v616_v54, %v563_v53 }
 0x209   :  { %v498_v55 = vpop.f32.mrf.mxu1 }
 0x20a   :  { %508 = vst [vmem:[#allocation10 + $0x8] sm:$0xff] %v504_v51  ;;  %v499_v56 = vadd.f32 %v563_v53, %v498_v55 }
 0x20c   :  { %507 = vst [vmem:[#allocation10] sm:$0xff] %v499_v56 }
 0x20d   :  { %768 = shalt.err (!%p765_p10)
}
 0x20e   :  { %520 = dma.vmem_to_hbm [thread:$0]  %s515_s23, 256, %s874_s6, [#allocation4], %s789_s7, %s789_s7, %s790_s8  }
 0x20f   :  { %783 = dma.done.wait [#allocation4], 256  }
 0x210   :  { %784 = vsyncadd [#allocation4], 4294967040 }
 0x211   :  { %524 = vsyncpa [#allocation3], 1 }
 0x212   :  { %525 = vsyncpa [#allocation6], 1 }
 0x213   :  { %526 = vsyncpa [#allocation9], 1 }
 0x214   :  { %527 = vsyncpa [#allocation4], 1 }

</bundles_post_ra>
